<compile_context>
chip_gen: v5e
topology: v5e:2x2
jax: 0.10.0
libtpu: 0.0.40
codegen_flags: <defaults>
</compile_context>

<pallas_src>
import numpy as np
import jax
import jax.numpy as jnp
from jax.experimental import pallas as pl
from jax.experimental.pallas import tpu as pltpu


B_TILE = 128  # batch elements per grid step == output lane width (lane-dense)


def fm_linear_kernel(x_smem, off_smem, table_ref, out_ref):
    # x_smem:    (B_pad * F,) int32  SMEM  -- flattened [batch, field] indices
    # off_smem:  (F,)         int32  SMEM  -- per-field vocabulary offsets
    # table_ref: (V, 1)       f32    VMEM  -- embedding table (resident across grid)
    # out_ref:   (1, B_TILE)  f32    VMEM  -- lane-dense output row for this tile
    bi = pl.program_id(0)
    num_fields = off_smem.shape[0]
    b_tile = out_ref.shape[1]
    vocab = table_ref.shape[0]
    lane = jax.lax.broadcasted_iota(jnp.int32, (1, b_tile), 1)  # hoisted out of loop
    tile_base = bi * b_tile

    def body(b_local, row):
        base = (tile_base + b_local) * num_fields
        acc = jnp.zeros((1, 1), jnp.float32)
        for f in range(num_fields):                  # F is static & small: unrolled
            v = x_smem[base + f] + off_smem[f]       # scalar path (SMEM reads + add)
            # Clamp: VMEM OOB reads are unchecked on TPU; nn.Embedding would raise
            # on out-of-range indices, so valid inputs are unaffected by the clamp.
            v = jnp.clip(v, 0, vocab - 1)
            acc = acc + table_ref[pl.ds(v, 1), :]    # dynamic row gather -> (1, 1)
        # Place this row's sum at lane b_local of the lane-dense output slab.
        return jnp.where(lane == b_local, acc, row)

    out_ref[...] = jax.lax.fori_loop(
        0, b_tile, body, jnp.zeros((1, b_tile), jnp.float32))


def fm_linear(x, offsets, table):
    """x: (B, F) int, offsets: (F,) int, table: (V, 1) f32 -> (B, 1) f32."""
    B, F = x.shape
    V, D = table.shape
    assert D == 1, "FMLinear always has output_dim=1 (linear term)."

    num_tiles = pl.cdiv(B, B_TILE)
    b_pad = num_tiles * B_TILE
    # Pad batch with index 0 (a valid row); padded outputs are sliced away below.
    x_pad = jnp.zeros((b_pad, F), jnp.int32).at[:B, :].set(x.astype(jnp.int32))
    x_flat = x_pad.reshape(-1)                       # 1-D -> compact SMEM layout
    offsets = offsets.reshape(-1).astype(jnp.int32)  # (F,)

    out = pl.pallas_call(
        fm_linear_kernel,
        out_shape=jax.ShapeDtypeStruct((num_tiles, B_TILE), jnp.float32),
        grid_spec=pltpu.PrefetchScalarGridSpec(
            num_scalar_prefetch=2,                   # x_flat, offsets -> SMEM
            grid=(num_tiles,),
            in_specs=[
                # Full table, same block every step -> stays resident in VMEM.
                pl.BlockSpec((V, D), lambda i, xs, offs: (0, 0)),
            ],
            out_specs=pl.BlockSpec((1, B_TILE), lambda i, xs, offs: (i, 0)),
        ),
        compiler_params=pltpu.CompilerParams(
            dimension_semantics=("parallel",)),      # megacore split on v7x
    )(x_flat, offsets, table)

    return out.reshape(-1)[:B, None]                 # back to (B, 1)


def fm_linear_ref(x, offsets, table):
    idx = x + offsets[None, :]     # (B, F)
    emb = table[idx]               # (B, F, D)
    return jnp.sum(emb, axis=1)    # (B, D)


if __name__ == "__main__":
    key = jax.random.PRNGKey(0)

    # Small, deterministic setup consistent with the module.
    field_dims = [3, 5, 7, 9]                        # sum = 24 vocabulary entries
    output_dim = 1
    B = 8
    F = len(field_dims)
    V = int(sum(field_dims))

    k_tab, k_x = jax.random.split(key)

    # nn.Embedding weight init: normal(mean=0, std=0.01)
    table = 0.01 * jax.random.normal(k_tab, (V, output_dim), dtype=jnp.float32)

    # offsets = (0, cumsum(field_dims)[:-1])
    offsets = jnp.asarray(
        np.array((0, *np.cumsum(field_dims)[:-1]), dtype=np.int32))   # (F,)

    # per-field categorical indices in [0, field_dims[f])
    cols = []
    for fd in field_dims:
        k_x, sub = jax.random.split(k_x)
        cols.append(jax.random.randint(sub, (B,), 0, fd, dtype=jnp.int32))
    x = jnp.stack(cols, axis=1)                      # (B, F) int32

    out = fm_linear(x, offsets, table)
    out = jax.block_until_ready(out)

    ref = fm_linear_ref(x, offsets, table)
    np.testing.assert_allclose(np.asarray(out), np.asarray(ref),
                               rtol=1e-5, atol=1e-6)

    print("KERNEL_OK")
</pallas_src>

<mosaic_0001>
module attributes {stable_mosaic.version = 11 : i64} {
  func.func @fm_linear_kernel(%arg0: i32, %arg1: memref<512xi32, #tpu.memory_space<smem>>, %arg2: memref<4xi32, #tpu.memory_space<smem>>, %arg3: memref<24x1xf32, #tpu.memory_space<vmem>>, %arg4: memref<1x128xf32, #tpu.memory_space<vmem>>) attributes {dimension_semantics = [#tpu.dimension_semantics<parallel>], iteration_bounds = array<i64: 1>, scalar_prefetch = 2 : i64, scratch_operands = 0 : i64, tpu.core_type = #tpu.core_type<tc>, window_params = [{pipeline_mode = #tpu.pipeline_mode<synchronous>, transform_indices = @transform_0, window_bounds = array<i64: 24, 1>}, {transform_indices = @transform_1, window_bounds = array<i64: 1, 128>}]} {
    %0 = tpu.iota {dimensions = array<i32: 1>} : vector<1x128xi32>
    %c128_i32 = arith.constant 128 : i32
    %1 = arith.muli %arg0, %c128_i32 : i32
    %cst = arith.constant 0.000000e+00 : f32
    %2 = vector.broadcast %cst : f32 to vector<1x128xf32>
    %c0_i32 = arith.constant 0 : i32
    %c128_i32_0 = arith.constant 128 : i32
    %3 = arith.addi %c0_i32, %c128_i32_0 : i32
    %c1_i32 = arith.constant 1 : i32
    %4 = scf.for %arg5 = %c0_i32 to %3 step %c1_i32 iter_args(%arg6 = %2) -> (vector<1x128xf32>)  : i32 {
      %6 = arith.addi %1, %arg5 : i32
      %c4_i32 = arith.constant 4 : i32
      %7 = arith.muli %6, %c4_i32 : i32
      %cst_3 = arith.constant 0.000000e+00 : f32
      %8 = vector.broadcast %cst_3 : f32 to vector<1x1xf32>
      %c0_i32_4 = arith.constant 0 : i32
      %9 = arith.addi %7, %c0_i32_4 : i32
      %10 = arith.index_cast %9 : i32 to index
      %11 = memref.load %arg1[%10] : memref<512xi32, #tpu.memory_space<smem>>
      %c0_5 = arith.constant 0 : index
      %12 = memref.load %arg2[%c0_5] : memref<4xi32, #tpu.memory_space<smem>>
      %13 = arith.addi %11, %12 : i32
      %c0_i32_6 = arith.constant 0 : i32
      %c23_i32 = arith.constant 23 : i32
      %14 = arith.maxsi %c0_i32_6, %13 : i32
      %15 = arith.minsi %c23_i32, %14 : i32
      %16 = arith.index_cast %15 : i32 to index
      %c0_7 = arith.constant 0 : index
      %17 = vector.load %arg3[%16, %c0_7] : memref<24x1xf32, #tpu.memory_space<vmem>>, vector<1x1xf32>
      %18 = arith.addf %8, %17 : vector<1x1xf32>
      %c1_i32_8 = arith.constant 1 : i32
      %19 = arith.addi %7, %c1_i32_8 : i32
      %20 = arith.index_cast %19 : i32 to index
      %21 = memref.load %arg1[%20] : memref<512xi32, #tpu.memory_space<smem>>
      %c1 = arith.constant 1 : index
      %22 = memref.load %arg2[%c1] : memref<4xi32, #tpu.memory_space<smem>>
      %23 = arith.addi %21, %22 : i32
      %c0_i32_9 = arith.constant 0 : i32
      %c23_i32_10 = arith.constant 23 : i32
      %24 = arith.maxsi %c0_i32_9, %23 : i32
      %25 = arith.minsi %c23_i32_10, %24 : i32
      %26 = arith.index_cast %25 : i32 to index
      %c0_11 = arith.constant 0 : index
      %27 = vector.load %arg3[%26, %c0_11] : memref<24x1xf32, #tpu.memory_space<vmem>>, vector<1x1xf32>
      %28 = arith.addf %18, %27 : vector<1x1xf32>
      %c2_i32 = arith.constant 2 : i32
      %29 = arith.addi %7, %c2_i32 : i32
      %30 = arith.index_cast %29 : i32 to index
      %31 = memref.load %arg1[%30] : memref<512xi32, #tpu.memory_space<smem>>
      %c2 = arith.constant 2 : index
      %32 = memref.load %arg2[%c2] : memref<4xi32, #tpu.memory_space<smem>>
      %33 = arith.addi %31, %32 : i32
      %c0_i32_12 = arith.constant 0 : i32
      %c23_i32_13 = arith.constant 23 : i32
      %34 = arith.maxsi %c0_i32_12, %33 : i32
      %35 = arith.minsi %c23_i32_13, %34 : i32
      %36 = arith.index_cast %35 : i32 to index
      %c0_14 = arith.constant 0 : index
      %37 = vector.load %arg3[%36, %c0_14] : memref<24x1xf32, #tpu.memory_space<vmem>>, vector<1x1xf32>
      %38 = arith.addf %28, %37 : vector<1x1xf32>
      %c3_i32 = arith.constant 3 : i32
      %39 = arith.addi %7, %c3_i32 : i32
      %40 = arith.index_cast %39 : i32 to index
      %41 = memref.load %arg1[%40] : memref<512xi32, #tpu.memory_space<smem>>
      %c3 = arith.constant 3 : index
      %42 = memref.load %arg2[%c3] : memref<4xi32, #tpu.memory_space<smem>>
      %43 = arith.addi %41, %42 : i32
      %c0_i32_15 = arith.constant 0 : i32
      %c23_i32_16 = arith.constant 23 : i32
      %44 = arith.maxsi %c0_i32_15, %43 : i32
      %45 = arith.minsi %c23_i32_16, %44 : i32
      %46 = arith.index_cast %45 : i32 to index
      %c0_17 = arith.constant 0 : index
      %47 = vector.load %arg3[%46, %c0_17] : memref<24x1xf32, #tpu.memory_space<vmem>>, vector<1x1xf32>
      %48 = arith.addf %38, %47 : vector<1x1xf32>
      %49 = vector.broadcast %arg5 : i32 to vector<1x128xi32>
      %50 = arith.cmpi eq, %0, %49 : vector<1x128xi32>
      %51 = vector.shape_cast %48 : vector<1x1xf32> to vector<1x1xf32>
      %52 = vector.broadcast %51 : vector<1x1xf32> to vector<1x128xf32>
      %53 = arith.select %50, %52, %arg6 : vector<1x128xi1>, vector<1x128xf32>
      scf.yield %53 : vector<1x128xf32>
    }
    %c128_i32_1 = arith.constant 128 : i32
    %c0 = arith.constant 0 : index
    %c0_2 = arith.constant 0 : index
    %5 = vector.load %arg4[%c0, %c0_2] : memref<1x128xf32, #tpu.memory_space<vmem>>, vector<1x128xf32>
    tpu.vector_store %arg4[%c0, %c0_2], %4 {strides = array<i32>} : memref<1x128xf32, #tpu.memory_space<vmem>>, vector<1x128xf32>,
    return
  }
  func.func @transform_0(%arg0: i32, %arg1: memref<512xi32, #tpu.memory_space<smem>>, %arg2: memref<4xi32, #tpu.memory_space<smem>>) -> (i32, i32) {
    %c0_i32 = arith.constant 0 : i32
    %c0_i32_0 = arith.constant 0 : i32
    %c0_i32_1 = arith.constant 0 : i32
    return %c0_i32, %c0_i32_0 : i32, i32
  }
  func.func @transform_1(%arg0: i32, %arg1: memref<512xi32, #tpu.memory_space<smem>>, %arg2: memref<4xi32, #tpu.memory_space<smem>>) -> (i32, i32) {
    %c0_i32 = arith.constant 0 : i32
    %c0_i32_0 = arith.constant 0 : i32
    return %arg0, %c0_i32 : i32, i32
  }
}

</mosaic_0001>

<bundles_post_ra>
// kernel: tpu_custom_call.1
= control target key start
LH: loop header
LB: loop body
LE: loop exit
PB: predicated region body
PF: predicated region fallthrough
CT: control target
= control target key end

     0   :  { %s237_s18 = smov [#allocation3]   ;;  %s238_s19 = smov [#allocation4]   ;;  %s292_s0 = inlined_call_operand.vmem [shape: s32[512], index: 0, kind: input, shape index: {}]   ;;  %s293_s2 = inlined_call_operand.vmem [shape: f32[24,1], index: 2, kind: input, shape index: {}]   ;;  %s294_s3 = inlined_call_operand.hbm [shape: f32[1,128], index: 3, kind: output, shape index: {}]   ;;  %s295_s1 = inlined_call_operand.vmem [shape: s32[4], index: 1, kind: input, shape index: {}]  }
   0x1   :  { %s9_s14 = sshll.u32 %s292_s0, 4  ;;  %s14_s17 = sshll.u32 %s295_s1, 4  ;;  %s10_s14 = int_to_ptr.vmem [resolvable:$true] %s9_s14  ;;  %s15_s17 = int_to_ptr.vmem [resolvable:$true] %s14_s17 }
   0x2   :  { %12 = dma.vmem_to_smem %s10_s14, 64, %s237_s18, [#allocation2] }
   0x3   :  { %17 = dma.vmem_to_smem %s15_s17, 16, %s238_s19, [#allocation2] }
   0x4   :  { %225 = dma.done.wait [#allocation2], 80 }
   0x5   :  { %226 = vsyncadd [#allocation2], 4294967216 }
   0x6   :  { %20 = sfence }
   0x7   :  { %21 = vsyncpa [#allocation6], 0  ;;  %v24_v0 = vlaneseq  ;;  %v229_v2 = vmov 0.0   ;;  %s267_s20 = smov 0  }
   0x9   :  { %v25_v1 = vand.u32 127, %v24_v0 }
   0xa LB: > { %s37_s0 = sld [smem:[#allocation4]]  ;;  %v239_v3 = vmov 0   ;;  %s116_s21 = sshll.u32 %s235_s20, 2  ;;  %v79_v11 = vstv %s235_s20  ;;  %s235_s20 = sphi %s267_s20, %s32_s20   ;;  %v231_v2 = vphi %v229_v2, %v230_v2  }
   0xb   : > { %168 = vset.pattern.permute.xlu0 %v239_v3  ;;  %s122_s1 = sld [smem:[#allocation4 + $0x1]]  ;;  %s46_s24 = sadd.s32 1, %s116_s21  ;;  %vm80_vm0 = vcmp.eq.s32.totalorder %v25_v1, %v79_v11 }
   0xc   : > { %s128_s22 = sld [smem:[#allocation4 + $0x2]]  ;;  %s57_s26 = sadd.s32 2, %s116_s21 }
   0xd   : > { %s36_s23 = sld [smem:[#allocation3 + %s116_s21]]  ;;  %s68_s28 = sadd.s32 3, %s116_s21 }
   0xe   : > { %s47_s25 = sld [smem:[#allocation3 + %s46_s24]]  ;;  %s32_s20 = sadd.s32 1, %s235_s20  }
   0xf   : > { %s58_s27 = sld [smem:[#allocation3 + %s57_s26]]  ;;  %p29_p8 = scmp.ge.s32.totalorder %s32_s20, 128  }
  0x10   : > { %s69_s29 = sld [smem:[#allocation3 + %s68_s28]] }
  0x11   : > { %s134_s4 = sld [smem:[#allocation4 + $0x3]] }
  0x13   : > { %s38_s30 = sadd.s32 %s37_s0, %s36_s23  ;;  %s240_s23 = smov (%p29_p8), [#allocation5]  }
  0x14   : > { %p39_p0 = scmp.gt.s32.totalorder %s38_s30, 0  ;;  %p117_p1 = scmp.lt.s32.totalorder %s38_s30, 23 }
  0x15   : > { %s49_s5 = sadd.s32 %s122_s1, %s47_s25  ;;  %s60_s6 = sadd.s32 %s128_s22, %s58_s27 }
  0x16   : > { %s297_s30 = smov (!%p39_p0, %s38_s30), 0  ;;  %p50_p2 = scmp.gt.s32.totalorder %s49_s5, 0 }
  0x17   : > { %p123_p3 = scmp.lt.s32.totalorder %s49_s5, 23  ;;  %s299_s30 = smov (!%p117_p1, %s297_s30), 23 }
  0x18   : > { %s301_s5 = smov (!%p50_p2, %s49_s5), 0  ;;  %s43_s9 = scalar_lea.vmem %s293_s2, %s299_s30 }
  0x19   : > { %p61_p4 = scmp.gt.s32.totalorder %s60_s6, 0  ;;  %s303_s5 = smov (!%p123_p3, %s301_s5), 23  ;;  %v44_v4 = vld [vmem:[%s43_s9] sm:$0x1] }
  0x1a   : > { %s54_s13 = scalar_lea.vmem %s293_s2, %s303_s5  ;;  %p129_p5 = scmp.lt.s32.totalorder %s60_s6, 23 }
  0x1b   : > { %s62_s10 = scalar_select %p61_p4, %s60_s6, 0  ;;  %v55_v5 = vld [vmem:[%s54_s13] sm:$0x1] }
  0x1c   : > { %s71_s14 = sadd.s32 %s134_s4, %s69_s29  ;;  %v56_v6 = vadd.f32 %v55_v5, %v44_v4  ;;  %s95_s22 = sshll.u32 (%p29_p8), %s294_s3, 4  ;;  %s96_s22 = int_to_ptr.hbm [resolvable:$true] %s95_s22 }
  0x1d   : > { %s305_s10 = smov (!%p129_p5, %s62_s10), 23  ;;  %p72_p6 = scmp.gt.s32.totalorder %s71_s14, 0 }
  0x1e   : > { %p135_p7 = scmp.lt.s32.totalorder %s71_s14, 23  ;;  %s65_s17 = scalar_lea.vmem %s293_s2, %s305_s10 }
  0x1f   : > { %v66_v7 = vld [vmem:[%s65_s17] sm:$0x1]  ;;  %s307_s14 = smov (!%p72_p6, %s71_s14), 0  ;;  %s93_s24 = sshll.u32 (%p29_p8), %s240_s23, 4  ;;  %s94_s24 = int_to_ptr.vmem [resolvable:$true] %s93_s24 }
  0x20   : > { %v67_v8 = vadd.f32 %v66_v7, %v56_v6  ;;  %s309_s14 = smov (!%p135_p7, %s307_s14), 23 }
  0x21   : > { %s76_s0 = scalar_lea.vmem %s293_s2, %s309_s14 }
  0x22   : > { %v77_v9 = vld [vmem:[%s76_s0] sm:$0x1] }
  0x23   : > { %v78_v10 = vadd.f32 %v77_v9, %v67_v8 }
  0x25   : > { %83 = vperm.xlu0 %168, %v78_v10  }
  0x95   :  { %31 = sbr.rel (!%p29_p8) target bundleno = 10 (0xa), region = 35 }
  0x97   : > { %v84_v12 = vpop.permute.xlu0 %83 }
  0x98   : > { %v86_v13 = vsel %vm80_vm0, %v84_v12, %v231_v2  }
  0x99   : > { %v230_v2 = vmov %v86_v13   ;;  %87 = vst [vmem:[#allocation5] sm:$0x1] (%p29_p8), %v86_v13 }
  0x9a   :  { %98 = dma.vmem_to_hbm [thread:$0]  %s94_s24, 16, %s96_s22, [#allocation6]  }
  0x9b   :  { %227 = dma.done.wait [#allocation6], 16  }
  0x9c   :  { %228 = vsyncadd [#allocation6], 4294967280 }
  0x9d   :  { %103 = vsyncpa [#allocation6], 1 }

</bundles_post_ra>
